<compile_context>
chip_gen: v7x
topology: tpu7x:2x2x1
jax: 0.10.0
libtpu: 0.0.40
codegen_flags: <defaults>
</compile_context>

<pallas_src>
import functools
from functools import partial

import jax
import jax.numpy as jnp
from jax import lax
from jax.experimental import pallas as pl
from jax.experimental.pallas import tpu as pltpu

_UNROLL_MAX_LAYERS = 4   # statically unroll the in-step hidden-layer loop up to here

try:
    # Single-buffer grid-invariant weights (don't double-buffer them in VMEM).
    _SINGLE_BUFFER = pl.Buffered(1)
except Exception:  # very old jax without pl.Buffered
    _SINGLE_BUFFER = None


def _vmem_capacity_bytes():
    """Physical VMEM per core; conservative 64 MiB default if the query fails."""
    try:
        return int(pltpu.get_tpu_info().vmem_capacity_bytes)
    except Exception:
        return 64 * 2**20


def _silu(z, approx):
    # PyTorch act(x) = x * sigmoid(x); z is f32 inside the kernel.
    if approx:
        # sigmoid(z) = 0.5 * (1 + tanh(z/2)): one EUP op (tanh); adds/muls are
        # VPU work that has slack.  (Old path was exp + reciprocal = 2 EUP ops.)
        return 0.5 * z * (1.0 + jnp.tanh(0.5 * z))
    return z * jax.nn.sigmoid(z)


def mlp_kernel(layers_per_step, approx, x_ref, w_in_ref, b_in_ref, w_h_ref,
               b_h_ref, w_out_ref, b_out_ref, o_ref, act_ref):
    """One batch tile.  Grid = (batch_tiles, layer_steps).

    layer_steps == 1        : all hidden layers VMEM-resident, looped in-kernel.
    layer_steps == n_layer  : streaming, one (H, H) hidden-weight slab per step.
    The f32 activation is carried across layer steps in `act_ref` (VMEM scratch).
    """
    cdt = w_in_ref.dtype                    # MXU operand dtype (bf16 fast / f32 precise)
    l = pl.program_id(1)

    @pl.when(l == 0)
    def _():                                # input layer + activation
        act_ref[...] = _silu(
            jnp.dot(x_ref[...], w_in_ref[...],
                    preferred_element_type=jnp.float32) + b_in_ref[...],
            approx)

    if layers_per_step > 0:                 # hidden layers owned by this step
        def layer(i, o):
            return _silu(
                jnp.dot(o.astype(cdt), w_h_ref[i],
                        preferred_element_type=jnp.float32)
                + b_h_ref[i][None, :],
                approx)

        o = act_ref[...]
        if layers_per_step <= _UNROLL_MAX_LAYERS:
            for i in range(layers_per_step):    # small fixed count: unroll
                o = layer(i, o)
        else:
            o = lax.fori_loop(0, layers_per_step, layer, o)  # deep: flat liveness
        act_ref[...] = o

    @pl.when(l == pl.num_programs(1) - 1)
    def _():                                # output layer (H -> 1), no activation
        # An N=1 matmul would use one MXU column and force 1-lane masked
        # stores; do a VPU broadcast-multiply + lane reduction instead, and
        # store the tile transposed so batch lands on the 128-lane axis
        # (lane-dense, unmasked store).  XLU transpose has slack here.
        o = act_ref[...]
        col = (jnp.sum(o * w_out_ref[...], axis=-1, keepdims=True)
               + b_out_ref[...])                                  # (bb, 1) f32
        o_ref[...] = jnp.transpose(col)[None].astype(o_ref.dtype)  # (1, 1, bb)


def _pick_batch_tile(B, dim, H, witem, weight_vmem, budget, dual_core, block_b):
    """Largest lane-dense batch tile that fits the VMEM budget."""
    if block_b is not None:
        bb = max(1, min(int(block_b), B))
        if bb < B:
            bb = max(8, (bb // 8) * 8)      # keep sublane alignment when tiled
        return bb
    # Rough per-row VMEM: double-buffered x tile + f32 activation scratch +
    # in-flight f32 temporaries + double-buffered output lane.
    per_row = 2 * dim * witem + 16 * H + 8
    avail = max(budget - weight_vmem, 2 * 2**20)
    bb = int(avail // max(per_row, 1))
    bb = max(128, (bb // 128) * 128)        # multiple of 128 -> unmasked stores
    bb = min(bb, 4096)
    if dual_core:
        # v7x only: keep a >=2-step, balanced grid so both TensorCores get work.
        while bb > 128 and -(-B // bb) < 2:
            bb = max(128, ((bb // 2) // 128) * 128)
        nt = -(-B // bb)
        if bb >= 256 and nt > 1 and nt % 2 == 1:
            bb = max(128, ((bb // 2) // 128) * 128)
    if bb >= B:
        bb = B                               # single full-batch tile (no padding)
    return bb


@functools.lru_cache(maxsize=None)
def _build_forward(num_tiles, n_steps, bb, dim, H, wh_layers, layers_per_step,
                   stream, approx, compute_dtype_name, out_dtype_name,
                   vmem_limit):
    """Memoized pallas_call builder (compute_dtype_name is part of the key only)."""
    out_dtype = jnp.dtype(out_dtype_name)

    def const_spec(shape):
        index_map = lambda i, l, _s=shape: (0,) * len(_s)
        if _SINGLE_BUFFER is not None:
            try:
                # Grid-invariant weights: don't double-buffer them in VMEM.
                return pl.BlockSpec(shape, index_map, pipeline_mode=_SINGLE_BUFFER)
            except TypeError:   # jax without BlockSpec(pipeline_mode=...)
                pass
        return pl.BlockSpec(shape, index_map)

    if stream:
        # Stream one hidden layer per grid step (double-buffered by default):
        # caps hidden-weight VMEM at ~2 slabs so deep nets fit v7x's 64 MiB,
        # with the next layer's DMA hidden behind the current layer's matmul.
        wh_spec = pl.BlockSpec((1, H, H), lambda i, l: (l, 0, 0))
        bh_spec = pl.BlockSpec((1, H), lambda i, l: (l, 0))
    else:
        wh_spec = const_spec((wh_layers, H, H))
        bh_spec = const_spec((wh_layers, H))

    kernel = partial(mlp_kernel, layers_per_step, approx)
    return pl.pallas_call(
        kernel,
        out_shape=jax.ShapeDtypeStruct((num_tiles, 1, bb), out_dtype),
        grid=(num_tiles, n_steps),
        in_specs=[
            pl.BlockSpec((bb, dim), lambda i, l: (i, 0)),   # x tile
            const_spec((dim, H)),                           # W_in
            const_spec((1, H)),                             # b_in
            wh_spec,                                        # W_hidden
            bh_spec,                                        # b_hidden
            const_spec((1, H)),                             # W_out as a row
            const_spec((1, 1)),                             # b_out
        ],
        out_specs=pl.BlockSpec((1, 1, bb), lambda i, l: (i, 0, 0)),  # lane-dense
        scratch_shapes=[pltpu.VMEM((bb, H), jnp.float32)],  # carried activation
        compiler_params=pltpu.CompilerParams(
            dimension_semantics=("parallel", "arbitrary"),
            vmem_limit_bytes=int(vmem_limit),
        ),
    )


def net_forward(x, params, *, block_b=None, precise=False, stream_layers=None):
    """Forward pass of Net.  x: (B, dim) -> (B, 1).  Safe to wrap in jax.jit."""
    w_in, b_in, w_h, b_h, w_out, b_out = params
    B, dim = x.shape
    H = w_in.shape[1]
    n_layer = int(w_h.shape[0]) if w_h.ndim == 3 else 0
    wh_layers = max(n_layer, 1)
    out_dtype = x.dtype

    # bf16 MXU operands feed the MXU at full rate; accumulation + SiLU stay f32.
    compute_dtype = jnp.float32 if precise else jnp.bfloat16
    witem = jnp.dtype(compute_dtype).itemsize

    # ---- generation-aware VMEM budget -------------------------------------
    phys = _vmem_capacity_bytes()
    dual_core = phys <= 80 * 2**20            # v7x: 64 MiB VMEM, 2 TensorCores
    budget = int(phys * (0.75 if dual_core else 0.80))   # headroom for scratch

    # ---- resident vs. layer-streamed hidden weights ------------------------
    resident_w_bytes = ((dim * H + wh_layers * H * H) * witem
                        + (H * (wh_layers + 2) + 1) * 4)
    if stream_layers is None:
        stream_layers = resident_w_bytes > budget // 2
    stream = bool(stream_layers) and n_layer >= 2
    n_steps = n_layer if stream else 1
    layers_per_step = 1 if stream else n_layer

    weight_vmem = ((dim * H + (2 if stream else wh_layers) * H * H) * witem
                   + (H * (wh_layers + 2) + 1) * 4)

    # ---- batch tile ---------------------------------------------------------
    bb = _pick_batch_tile(B, dim, H, witem, weight_vmem, budget, dual_core,
                          block_b)
    num_tiles = -(-B // bb)
    B_pad = num_tiles * bb

    # ---- operand preparation ------------------------------------------------
    xc = x.astype(compute_dtype)
    if B_pad != B:
        xc = jnp.pad(xc, ((0, B_pad - B), (0, 0)))    # zero-pad ragged batch
    w_in_c = w_in.astype(compute_dtype)
    if n_layer > 0:
        w_h_c = w_h.astype(compute_dtype)
        b_h_f = b_h.astype(jnp.float32)
    else:
        w_h_c = jnp.zeros((1, H, H), compute_dtype)   # dummy slab, never read
        b_h_f = jnp.zeros((1, H), jnp.float32)
    b_in_f = b_in.reshape(1, H).astype(jnp.float32)
    w_out_row = w_out.reshape(1, H).astype(jnp.float32)   # (H, 1) -> (1, H) row
    b_out_f = b_out.reshape(1, 1).astype(jnp.float32)
    # NOTE: if this kernel ever becomes MXU-bound (large H), pad H to a
    # multiple of 128 here and slice the final reduction back.

    fwd = _build_forward(num_tiles, n_steps, bb, dim, H, wh_layers,
                         layers_per_step, stream, not precise,
                         jnp.dtype(compute_dtype).name,
                         jnp.dtype(out_dtype).name, budget)
    out = fwd(xc, w_in_c, b_in_f, w_h_c, b_h_f, w_out_row, b_out_f)
    out = out.reshape(B_pad, 1)
    return out[:B] if B_pad != B else out


def init_params(key, n_layer, n_hidden, dim, dtype=jnp.float32):
    """Deterministic PyTorch-style Linear init: U(-1/sqrt(fan_in), 1/sqrt(fan_in))."""
    keys = jax.random.split(key, 2 * (n_layer + 2))

    def linear(kw, kb, fan_in, fan_out):
        bound = 1.0 / (fan_in ** 0.5)
        w = jax.random.uniform(kw, (fan_in, fan_out), dtype, -bound, bound)
        b = jax.random.uniform(kb, (fan_out,), dtype, -bound, bound)
        return w, b

    w_in, b_in = linear(keys[0], keys[1], dim, n_hidden)
    if n_layer > 0:
        pairs = [linear(keys[2 + 2 * i], keys[3 + 2 * i], n_hidden, n_hidden)
                 for i in range(n_layer)]
        w_h = jnp.stack([p[0] for p in pairs])
        b_h = jnp.stack([p[1] for p in pairs])
    else:
        w_h = jnp.zeros((0, n_hidden, n_hidden), dtype)
        b_h = jnp.zeros((0, n_hidden), dtype)
    w_out, b_out = linear(keys[-2], keys[-1], n_hidden, 1)
    return w_in, b_in, w_h, b_h, w_out, b_out


def _reference(x, params):
    w_in, b_in, w_h, b_h, w_out, b_out = params
    act = lambda z: z * jax.nn.sigmoid(z)
    o = act(x @ w_in + b_in)
    for i in range(w_h.shape[0]):
        o = act(o @ w_h[i] + b_h[i])
    return o @ w_out + b_out


if __name__ == "__main__":
    # Small shapes consistent with the module: Net(n_layer=2, n_hidden=32, dim=2)
    n_layer, n_hidden, dim = 2, 32, 2
    batch = 16

    key = jax.random.PRNGKey(0)
    k_params, k_x = jax.random.split(key)
    params = init_params(k_params, n_layer, n_hidden, dim)
    x = jax.random.normal(k_x, (batch, dim), jnp.float32)

    ref = _reference(x, params)

    # Precise path (f32 MXU operands, exact sigmoid): tight tolerance.
    out_precise = jax.block_until_ready(net_forward(x, params, precise=True))
    assert out_precise.shape == (batch, 1)
    assert jnp.allclose(out_precise, ref, atol=1e-5, rtol=1e-5)

    # Fast path (bf16 MXU operands + single-tanh SiLU): loose tolerance.
    out_fast = jax.block_until_ready(net_forward(x, params))
    assert out_fast.shape == (batch, 1)
    assert jnp.allclose(out_fast.astype(jnp.float32), ref, atol=5e-2, rtol=5e-2)

    # Layer-streaming path (one hidden-weight slab per grid step, v7x-style).
    out_stream = jax.block_until_ready(net_forward(x, params, stream_layers=True))
    assert out_stream.shape == (batch, 1)
    assert jnp.allclose(out_stream.astype(jnp.float32), ref, atol=5e-2, rtol=5e-2)

    # jit-friendly: memoized pallas_call, no per-call probing / host sync.
    jitted = jax.jit(lambda xv, p: net_forward(xv, p))
    out_jit = jax.block_until_ready(jitted(x, params))
    assert jnp.allclose(out_jit.astype(jnp.float32), ref, atol=5e-2, rtol=5e-2)

    print("KERNEL_OK")
</pallas_src>

<mosaic_0001>
module attributes {stable_mosaic.version = 11 : i64} {
  func.func @mlp_kernel(%arg0: i32, %arg1: i32, %arg2: memref<16x2xf32, #tpu.memory_space<vmem>>, %arg3: memref<2x32xf32, #tpu.memory_space<vmem>>, %arg4: memref<1x32xf32, #tpu.memory_space<vmem>>, %arg5: memref<2x32x32xf32, #tpu.memory_space<vmem>>, %arg6: memref<2x32xf32, #tpu.memory_space<vmem>>, %arg7: memref<1x32xf32, #tpu.memory_space<vmem>>, %arg8: memref<1x1xf32, #tpu.memory_space<vmem>>, %arg9: memref<1x1x16xf32, #tpu.memory_space<vmem>>, %arg10: memref<16x32xf32, #tpu.memory_space<vmem>>) attributes {dimension_semantics = [#tpu.dimension_semantics<parallel>, #tpu.dimension_semantics<arbitrary>], iteration_bounds = array<i64: 1, 1>, scalar_prefetch = 0 : i64, scratch_operands = 1 : i64, tpu.core_type = #tpu.core_type<tc>, window_params = [{transform_indices = @transform_0, window_bounds = array<i64: 16, 2>}, {pipeline_mode = #tpu.pipeline_mode<synchronous>, transform_indices = @transform_1, window_bounds = array<i64: 2, 32>}, {pipeline_mode = #tpu.pipeline_mode<synchronous>, transform_indices = @transform_2, window_bounds = array<i64: 1, 32>}, {pipeline_mode = #tpu.pipeline_mode<synchronous>, transform_indices = @transform_3, window_bounds = array<i64: 2, 32, 32>}, {pipeline_mode = #tpu.pipeline_mode<synchronous>, transform_indices = @transform_4, window_bounds = array<i64: 2, 32>}, {pipeline_mode = #tpu.pipeline_mode<synchronous>, transform_indices = @transform_5, window_bounds = array<i64: 1, 32>}, {pipeline_mode = #tpu.pipeline_mode<synchronous>, transform_indices = @transform_6, window_bounds = array<i64: 1, 1>}, {transform_indices = @transform_7, window_bounds = array<i64: 1, 1, 16>}]} {
    %c0_i32 = arith.constant 0 : i32
    %0 = arith.cmpi eq, %arg1, %c0_i32 : i32
    %1 = arith.extui %0 : i1 to i32
    %c0_i32_0 = arith.constant 0 : i32
    %2 = arith.cmpi ne, %1, %c0_i32_0 : i32
    scf.if %2 {
      %c0_18 = arith.constant 0 : index
      %c0_19 = arith.constant 0 : index
      %36 = vector.load %arg2[%c0_18, %c0_19] : memref<16x2xf32, #tpu.memory_space<vmem>>, vector<16x2xf32>
      %c0_20 = arith.constant 0 : index
      %c0_21 = arith.constant 0 : index
      %37 = vector.load %arg3[%c0_20, %c0_21] : memref<2x32xf32, #tpu.memory_space<vmem>>, vector<2x32xf32>
      %cst_22 = arith.constant dense<0.000000e+00> : vector<16x32xf32>
      %38 = tpu.matmul %36, %37, %cst_22 {dimension_numbers = #tpu.dot_dimension_numbers<[1], [0], [0], [1], [0, 0, 1, 1], [], []>} : vector<16x2xf32>, vector<2x32xf32>, vector<16x32xf32> -> vector<16x32xf32>
      %c0_23 = arith.constant 0 : index
      %c0_24 = arith.constant 0 : index
      %39 = vector.load %arg4[%c0_23, %c0_24] : memref<1x32xf32, #tpu.memory_space<vmem>>, vector<1x32xf32>
      %40 = vector.broadcast %39 : vector<1x32xf32> to vector<16x32xf32>
      %41 = arith.addf %38, %40 : vector<16x32xf32>
      %42 = arith.negf %41 : vector<16x32xf32>
      %43 = math.exp %42 : vector<16x32xf32>
      %cst_25 = arith.constant 1.000000e+00 : f32
      %44 = vector.broadcast %cst_25 : f32 to vector<16x32xf32>
      %45 = arith.addf %44, %43 : vector<16x32xf32>
      %46 = arith.divf %44, %45 : vector<16x32xf32>
      %47 = arith.mulf %41, %46 : vector<16x32xf32>
      %c0_26 = arith.constant 0 : index
      %c0_27 = arith.constant 0 : index
      %48 = vector.load %arg10[%c0_26, %c0_27] : memref<16x32xf32, #tpu.memory_space<vmem>>, vector<16x32xf32>
      tpu.vector_store %arg10[%c0_26, %c0_27], %47 {strides = array<i32>} : memref<16x32xf32, #tpu.memory_space<vmem>>, vector<16x32xf32>,
    } else {
    }
    %c0 = arith.constant 0 : index
    %c0_1 = arith.constant 0 : index
    %3 = vector.load %arg10[%c0, %c0_1] : memref<16x32xf32, #tpu.memory_space<vmem>>, vector<16x32xf32>
    %c0_2 = arith.constant 0 : index
    %c0_3 = arith.constant 0 : index
    %c0_4 = arith.constant 0 : index
    %4 = vector.load %arg5[%c0_2, %c0_3, %c0_4] : memref<2x32x32xf32, #tpu.memory_space<vmem>>, vector<1x32x32xf32>
    %5 = vector.shape_cast %4 : vector<1x32x32xf32> to vector<32x32xf32>
    %cst = arith.constant dense<0.000000e+00> : vector<16x32xf32>
    %6 = tpu.matmul %3, %5, %cst {dimension_numbers = #tpu.dot_dimension_numbers<[1], [0], [0], [1], [0, 0, 1, 1], [], []>} : vector<16x32xf32>, vector<32x32xf32>, vector<16x32xf32> -> vector<16x32xf32>
    %c0_5 = arith.constant 0 : index
    %c0_6 = arith.constant 0 : index
    %7 = vector.load %arg6[%c0_5, %c0_6] : memref<2x32xf32, #tpu.memory_space<vmem>>, vector<1x32xf32>
    %8 = vector.shape_cast %7 : vector<1x32xf32> to vector<32xf32>
    %9 = vector.shape_cast %8 : vector<32xf32> to vector<1x32xf32>
    %10 = vector.broadcast %9 : vector<1x32xf32> to vector<16x32xf32>
    %11 = arith.addf %6, %10 : vector<16x32xf32>
    %12 = arith.negf %11 : vector<16x32xf32>
    %13 = math.exp %12 : vector<16x32xf32>
    %cst_7 = arith.constant 1.000000e+00 : f32
    %14 = vector.broadcast %cst_7 : f32 to vector<16x32xf32>
    %15 = arith.addf %14, %13 : vector<16x32xf32>
    %16 = arith.divf %14, %15 : vector<16x32xf32>
    %17 = arith.mulf %11, %16 : vector<16x32xf32>
    %c1 = arith.constant 1 : index
    %c0_8 = arith.constant 0 : index
    %c0_9 = arith.constant 0 : index
    %18 = vector.load %arg5[%c1, %c0_8, %c0_9] : memref<2x32x32xf32, #tpu.memory_space<vmem>>, vector<1x32x32xf32>
    %19 = vector.shape_cast %18 : vector<1x32x32xf32> to vector<32x32xf32>
    %cst_10 = arith.constant dense<0.000000e+00> : vector<16x32xf32>
    %20 = tpu.matmul %17, %19, %cst_10 {dimension_numbers = #tpu.dot_dimension_numbers<[1], [0], [0], [1], [0, 0, 1, 1], [], []>} : vector<16x32xf32>, vector<32x32xf32>, vector<16x32xf32> -> vector<16x32xf32>
    %c1_11 = arith.constant 1 : index
    %c0_12 = arith.constant 0 : index
    %21 = vector.load %arg6[%c1_11, %c0_12] : memref<2x32xf32, #tpu.memory_space<vmem>>, vector<1x32xf32>
    %22 = vector.shape_cast %21 : vector<1x32xf32> to vector<32xf32>
    %23 = vector.shape_cast %22 : vector<32xf32> to vector<1x32xf32>
    %24 = vector.broadcast %23 : vector<1x32xf32> to vector<16x32xf32>
    %25 = arith.addf %20, %24 : vector<16x32xf32>
    %26 = arith.negf %25 : vector<16x32xf32>
    %27 = math.exp %26 : vector<16x32xf32>
    %cst_13 = arith.constant 1.000000e+00 : f32
    %28 = vector.broadcast %cst_13 : f32 to vector<16x32xf32>
    %29 = arith.addf %28, %27 : vector<16x32xf32>
    %30 = arith.divf %28, %29 : vector<16x32xf32>
    %31 = arith.mulf %25, %30 : vector<16x32xf32>
    %c0_14 = arith.constant 0 : index
    %c0_15 = arith.constant 0 : index
    %32 = vector.load %arg10[%c0_14, %c0_15] : memref<16x32xf32, #tpu.memory_space<vmem>>, vector<16x32xf32>
    tpu.vector_store %arg10[%c0_14, %c0_15], %31 {strides = array<i32>} : memref<16x32xf32, #tpu.memory_space<vmem>>, vector<16x32xf32>,
    %c0_i32_16 = arith.constant 0 : i32
    %33 = arith.cmpi eq, %arg1, %c0_i32_16 : i32
    %34 = arith.extui %33 : i1 to i32
    %c0_i32_17 = arith.constant 0 : i32
    %35 = arith.cmpi ne, %34, %c0_i32_17 : i32
    scf.if %35 {
      %c0_18 = arith.constant 0 : index
      %c0_19 = arith.constant 0 : index
      %36 = vector.load %arg10[%c0_18, %c0_19] : memref<16x32xf32, #tpu.memory_space<vmem>>, vector<16x32xf32>
      %c0_20 = arith.constant 0 : index
      %c0_21 = arith.constant 0 : index
      %37 = vector.load %arg7[%c0_20, %c0_21] : memref<1x32xf32, #tpu.memory_space<vmem>>, vector<1x32xf32>
      %38 = vector.broadcast %37 : vector<1x32xf32> to vector<16x32xf32>
      %39 = arith.mulf %36, %38 : vector<16x32xf32>
      %cst_22 = arith.constant dense<0.000000e+00> : vector<16xf32>
      %40 = vector.multi_reduction <add>, %39, %cst_22 [1] : vector<16x32xf32> to vector<16xf32>
      %41 = vector.shape_cast %40 : vector<16xf32> to vector<16x1xf32>
      %c0_23 = arith.constant 0 : index
      %c0_24 = arith.constant 0 : index
      %42 = vector.load %arg8[%c0_23, %c0_24] : memref<1x1xf32, #tpu.memory_space<vmem>>, vector<1x1xf32>
      %43 = vector.broadcast %42 : vector<1x1xf32> to vector<16x1xf32>
      %44 = arith.addf %41, %43 : vector<16x1xf32>
      %45 = tpu.transpose %44, [1, 0] : vector<16x1xf32> -> vector<1x16xf32>
      %46 = vector.shape_cast %45 : vector<1x16xf32> to vector<1x1x16xf32>
      %c0_25 = arith.constant 0 : index
      %c0_26 = arith.constant 0 : index
      %c0_27 = arith.constant 0 : index
      %47 = vector.load %arg9[%c0_25, %c0_26, %c0_27] : memref<1x1x16xf32, #tpu.memory_space<vmem>>, vector<1x1x16xf32>
      tpu.vector_store %arg9[%c0_25, %c0_26, %c0_27], %46 {strides = array<i32>} : memref<1x1x16xf32, #tpu.memory_space<vmem>>, vector<1x1x16xf32>,
    } else {
    }
    return
  }
  func.func @transform_0(%arg0: i32, %arg1: i32) -> (i32, i32) {
    %c0_i32 = arith.constant 0 : i32
    %c0_i32_0 = arith.constant 0 : i32
    return %arg0, %c0_i32 : i32, i32
  }
  func.func @transform_1(%arg0: i32, %arg1: i32) -> (i32, i32) {
    %c0_i32 = arith.constant 0 : i32
    %c0_i32_0 = arith.constant 0 : i32
    %c0_i32_1 = arith.constant 0 : i32
    return %c0_i32, %c0_i32_0 : i32, i32
  }
  func.func @transform_2(%arg0: i32, %arg1: i32) -> (i32, i32) {
    %c0_i32 = arith.constant 0 : i32
    %c0_i32_0 = arith.constant 0 : i32
    %c0_i32_1 = arith.constant 0 : i32
    return %c0_i32, %c0_i32_0 : i32, i32
  }
  func.func @transform_3(%arg0: i32, %arg1: i32) -> (i32, i32, i32) {
    %c0_i32 = arith.constant 0 : i32
    %c0_i32_0 = arith.constant 0 : i32
    %c0_i32_1 = arith.constant 0 : i32
    %c0_i32_2 = arith.constant 0 : i32
    return %c0_i32, %c0_i32_0, %c0_i32_1 : i32, i32, i32
  }
  func.func @transform_4(%arg0: i32, %arg1: i32) -> (i32, i32) {
    %c0_i32 = arith.constant 0 : i32
    %c0_i32_0 = arith.constant 0 : i32
    %c0_i32_1 = arith.constant 0 : i32
    return %c0_i32, %c0_i32_0 : i32, i32
  }
  func.func @transform_5(%arg0: i32, %arg1: i32) -> (i32, i32) {
    %c0_i32 = arith.constant 0 : i32
    %c0_i32_0 = arith.constant 0 : i32
    %c0_i32_1 = arith.constant 0 : i32
    return %c0_i32, %c0_i32_0 : i32, i32
  }
  func.func @transform_6(%arg0: i32, %arg1: i32) -> (i32, i32) {
    %c0_i32 = arith.constant 0 : i32
    %c0_i32_0 = arith.constant 0 : i32
    %c0_i32_1 = arith.constant 0 : i32
    return %c0_i32, %c0_i32_0 : i32, i32
  }
  func.func @transform_7(%arg0: i32, %arg1: i32) -> (i32, i32, i32) {
    %c0_i32 = arith.constant 0 : i32
    %c0_i32_0 = arith.constant 0 : i32
    %c0_i32_1 = arith.constant 0 : i32
    return %arg0, %c0_i32, %c0_i32_0 : i32, i32, i32
  }
}

</mosaic_0001>

<bundles_post_ra>
// kernel: tpu_custom_call.1
= control target key start
LH: loop header
LB: loop body
LE: loop exit
PB: predicated region body
PF: predicated region fallthrough
CT: control target
= control target key end

     0   :  { %s707_s0 = inlined_call_operand.vmem [shape: f32[16,2], index: 0, kind: input, shape index: {}]   ;;  %s708_s1 = inlined_call_operand.vmem [shape: f32[2,32], index: 1, kind: input, shape index: {}]   ;;  %s709_s2 = inlined_call_operand.vmem [shape: f32[1,32], index: 2, kind: input, shape index: {}]   ;;  %s710_s3 = inlined_call_operand.hbm [shape: f32[2,32,32], index: 3, kind: input, shape index: {}]   ;;  %s711_s4 = inlined_call_operand.vmem [shape: f32[2,32], index: 4, kind: input, shape index: {}]   ;;  %s712_s5 = inlined_call_operand.vmem [shape: f32[1,32], index: 5, kind: input, shape index: {}]   ;;  %s713_s6 = inlined_call_operand.<no memory space> [shape: f32[1,1], index: 6, kind: input, shape index: {}]   ;;  %s714_s7 = inlined_call_operand.hbm [shape: f32[1,1,16], index: 7, kind: output, shape index: {}]  }
   0x1   :  { %v12_v0 = vstv %s713_s6 }
   0x2   :  { %13 = vst [vmem:[#allocation3] sm:$0x1] %v12_v0 }
   0x3   :  { %14 = vsyncpa [#allocation5], 0 }
   0x4   :  { %15 = vsyncpa [#allocation6], 0  ;;  %s605_s26 = smov [#allocation4]   ;;  %s557_s30 = scalar_lea.hbm %s710_s3, 1024 }
   0x5   :  { %s27_s27 = sshll.u32 %s605_s26, 4  ;;  %p558_p0 = scmp.ne.s32.totalorder %s710_s3, %s557_s30  ;;  %s28_s27 = int_to_ptr.vmem [resolvable:$true] %s27_s27 }
   0x6   :  { %p561_p1 = scmp.lt.u32.totalorder %s557_s30, %s710_s3 }
   0x8   :  { %p563_p2 = pnand %p561_p1, %p558_p0 }
   0xa   :  { %566 = shalt.err (!%p563_p2)
}
   0xb   :  { %s567_s6 = scalar_lea.vmem %s28_s27, 1024  ;;  %p572_p4 = scmp.lt.s32.totalorder %s28_s27, %s28_s27 }
   0xc   :  { %p568_p3 = scmp.ne.s32.totalorder %s28_s27, %s567_s6  ;;  %p573_p5 = scmp.lt.s32.totalorder %s567_s6, %s567_s6 }
   0xe   :  { %p574_p6 = por %p573_p5, %p572_p4 }
  0x10   :  { %p575_p7 = pnand %p574_p6, %p568_p3 }
  0x12   :  { %578 = shalt.err (!%p575_p7)
}
  0x13   :  { %s606_s12 = smov 128   ;;  %s607_s13 = smov 8  }
  0x14   :  { %33 = dma.hbm_to_vmem [thread:$0]  %s710_s3, 1024, %s28_s27, [#allocation5], %s606_s12, %s606_s12, %s607_s13  }
  0x15   :  { %601 = dma.done.wait [#allocation5], 1024  }
  0x16   :  { %602 = vsyncadd [#allocation5], 4294966272  ;;  %vm64_vm0 = vcmask 1041408   ;;  %vm57_vm1 = vcmask 15360   ;;  %v49_v1 = vld [vmem:[%s708_s1] sm:$0x3] }
  0x17   :  { %v47_v2 = vld [vmem:[%s707_s0] sm:$0xff]  ;;  %v48_v3 = vld [vmem:[%s707_s0 + $0x8] sm:$0xff]  ;;  %485 = vmatprep.subr.msk.mxu0 %vm64_vm0, %v49_v1  ;;  %v162_v4 = vld [vmem:[#allocation4] sm:$0xff]  ;;  %vm157_vm2 = vcmask 261120   ;;  %s608_s25 = smov [#allocation7]   ;;  %vm435_vm3 = vcmask 122880  }
  0x18   :  { %487 = vmatprep.mubr.msk.f32.mxu0 %vm57_vm1, %v47_v2  ;;  %486 = vmatpush3.msk.msra.mxu0 %vm64_vm0, %v49_v1  ;;  %v163_v5 = vld [vmem:[#allocation4 + $0x8] sm:$0xff]  ;;  %v164_v7 = vld [vmem:[#allocation4 + $0x10] sm:$0xff]  ;;  %v165_v8 = vld [vmem:[#allocation4 + $0x18] sm:$0xff]  ;;  %s443_s26 = sshll.u32 %s608_s25, 4  ;;  %s444_s26 = int_to_ptr.vmem [resolvable:$true] %s443_s26 }
  0x19   :  { %488 = vmatmul.mubr.msk.f32.vlgmr.msra.gmra.mrb[0].mxu0 %vm57_vm1, %v48_v3  ;;  %v512_v6 = vpack.c.bf16 %v163_v5, %v162_v4  ;;  %v516_v9 = vpack.c.bf16 %v165_v8, %v164_v7  ;;  %v452_v10 = vld [vmem:[%s709_s2] ss:$0 sm:$0xff]  ;;  %v268_v27 = vld [vmem:[#allocation4 + $0x20] sm:$0xff]  ;;  %v270_v30 = vld [vmem:[#allocation4 + $0x30] sm:$0xff]  ;;  %s583_s27 = scalar_lea.vmem %s444_s26, 32  ;;  %p584_p9 = scmp.lt.s32.totalorder %s444_s26, %s444_s26 }
  0x1a   :  { %v269_v28 = vld [vmem:[#allocation4 + $0x28] sm:$0xff]  ;;  %v271_v31 = vld [vmem:[#allocation4 + $0x38] sm:$0xff]  ;;  %v463_v48 = vld [vmem:[%s711_s4 + $0x1] ss:$0 sm:$0xff] }
  0x1b   :  { %513 = vmatprep.subr.bf16.mxu1 %v512_v6  ;;  %v520_v29 = vpack.c.bf16 %v269_v28, %v268_v27  ;;  %v524_v32 = vpack.c.bf16 %v271_v31, %v270_v30  ;;  %v458_v33 = vld [vmem:[%s711_s4] ss:$0 sm:$0xff] }
  0x1c   :  { %515 = vmatpush3.bf16.msra.mxu1 %v512_v6  ;;  %v468_v63 = vld [vmem:[%s712_s5] ss:$0 sm:$0xff]  ;;  %v469_v6 = vld [vmem:[#allocation3] ss:$0 sm:$0xff]  ;;  %s579_s5 = scalar_lea.vmem %s444_s26, 16 }
  0x1d   :  { %517 = vmatprep.subr.bf16.mxu1 %v516_v9  ;;  %521 = vmatprep.subr.bf16.mxu0 %v520_v29  ;;  %p580_p8 = scmp.ne.s32.totalorder %s444_s26, %s579_s5  ;;  %p585_p10 = scmp.lt.s32.totalorder %s583_s27, %s579_s5 }
  0x1e   :  { %523 = vmatpush3.bf16.msra.mxu0 %v520_v29 }
  0x1f   :  { %525 = vmatprep.subr.bf16.mxu0 %v524_v32  ;;  %p586_p11 = por %p585_p10, %p584_p9 }
  0x20   :  { %519 = vmatpush3.bf16.msra.mxu1 %v516_v9 }
  0x21   :  { %p587_p12 = pnand %p586_p11, %p580_p8 }
  0x22   :  { %527 = vmatpush3.bf16.msra.mxu0 %v524_v32 }
  0xec   :  { %v489_v11 = vpop.f32.mrb[0].mxu0 }
  0xed   :  { %v140_v12 = vadd.f32 %v489_v11, %v452_v10  ;;  %v134_v13 = vpop.f32.mrb[1].mxu0 }
  0xee   :  { %v135_v14 = vadd.f32 %v452_v10, %v134_v13 }
  0xef   :  { %v457_v15 = vmul.f32 -1.442695, %v140_v12 }
  0xf0   :  { %v456_v16 = vmul.f32 -1.442695, %v135_v14 }
  0xf1   :  { %533 = vpow2.f32 %v457_v15 }
  0xf2   :  { %535 = vpow2.f32 %v456_v16 }
  0xfb   :  { %v534_v17 = vpop.eup %533 }
  0xfc   :  { %v536_v18 = vpop.eup %535  ;;  %v150_v19 = vadd.f32 1.0, %v534_v17 }
  0xfd   :  { %v149_v20 = vadd.f32 1.0, %v536_v18 }
  0xfe   :  { %537 = vrcp.f32 %v150_v19 }
  0xff   :  { %539 = vrcp.f32 %v149_v20 }
 0x108   :  { %v538_v21 = vpop.eup %537 }
 0x109   :  { %v540_v22 = vpop.eup %539  ;;  %v156_v23 = vmul.f32 %v538_v21, %v140_v12 }
 0x10a   :  { %v155_v24 = vmul.f32 %v540_v22, %v135_v14 }
 0x10b   :  { %159 = vst.msk [vmem:[#allocation2 + $0x8] sm:$0xff] %vm157_vm2, %v156_v23 }
 0x10c   :  { %158 = vst.msk [vmem:[#allocation2] sm:$0xff] %vm157_vm2, %v155_v24 }
 0x112   :  { %v161_v26 = vld [vmem:[#allocation2 + $0x8] sm:$0xff] }
 0x113   :  { %v160_v25 = vld [vmem:[#allocation2] sm:$0xff] }
 0x114   :  { %498 = vmatprep.mubr.msk.f32.mxu1 %vm157_vm2, %v160_v25 }
 0x115   :  { %499 = vmatmul.mubr.msk.f32.vlgmr.msra.gmra.mrb[0].mxu1 %vm157_vm2, %v161_v26 }
 0x1e8   :  { %v500_v34 = vpop.f32.mrb[0].mxu1 }
 0x1e9   :  { %v250_v35 = vadd.f32 %v500_v34, %v458_v33  ;;  %v244_v36 = vpop.f32.mrb[1].mxu1 }
 0x1ea   :  { %v245_v37 = vadd.f32 %v458_v33, %v244_v36 }
 0x1eb   :  { %v462_v38 = vmul.f32 -1.442695, %v250_v35 }
 0x1ec   :  { %v461_v39 = vmul.f32 -1.442695, %v245_v37 }
 0x1ed   :  { %541 = vpow2.f32 %v462_v38 }
 0x1ee   :  { %543 = vpow2.f32 %v461_v39 }
 0x1f7   :  { %v542_v40 = vpop.eup %541 }
 0x1f8   :  { %v544_v41 = vpop.eup %543  ;;  %v260_v42 = vadd.f32 1.0, %v542_v40 }
 0x1f9   :  { %v259_v43 = vadd.f32 1.0, %v544_v41 }
 0x1fa   :  { %545 = vrcp.f32 %v260_v42 }
 0x1fb   :  { %547 = vrcp.f32 %v259_v43 }
 0x204   :  { %v546_v44 = vpop.eup %545 }
 0x205   :  { %v548_v45 = vpop.eup %547  ;;  %v266_v47 = vmul.f32 %v546_v44, %v250_v35 }
 0x206   :  { %v265_v46 = vmul.f32 %v548_v45, %v245_v37 }
 0x208   :  { %509 = vmatprep.mubr.msk.f32.mxu0 %vm157_vm2, %v265_v46 }
 0x209   :  { %510 = vmatmul.mubr.msk.f32.vlgmr.msra.gmra.mrb[2].mxu0 %vm157_vm2, %v266_v47 }
 0x2dc   :  { %v511_v49 = vpop.f32.mrb[2].mxu0 }
 0x2dd   :  { %v355_v50 = vadd.f32 %v511_v49, %v463_v48  ;;  %v349_v51 = vpop.f32.mrb[3].mxu0 }
 0x2de   :  { %v350_v52 = vadd.f32 %v463_v48, %v349_v51 }
 0x2df   :  { %v467_v53 = vmul.f32 -1.442695, %v355_v50 }
 0x2e0   :  { %v466_v54 = vmul.f32 -1.442695, %v350_v52 }
 0x2e1   :  { %549 = vpow2.f32 %v467_v53 }
 0x2e2   :  { %551 = vpow2.f32 %v466_v54 }
 0x2eb   :  { %v550_v55 = vpop.eup %549 }
 0x2ec   :  { %v552_v56 = vpop.eup %551  ;;  %v365_v57 = vadd.f32 1.0, %v550_v55 }
 0x2ed   :  { %v364_v58 = vadd.f32 1.0, %v552_v56 }
 0x2ee   :  { %553 = vrcp.f32 %v365_v57 }
 0x2ef   :  { %555 = vrcp.f32 %v364_v58 }
 0x2f8   :  { %v554_v59 = vpop.eup %553 }
 0x2f9   :  { %v556_v60 = vpop.eup %555  ;;  %v371_v61 = vmul.f32 %v554_v59, %v355_v50 }
 0x2fa   :  { %v370_v62 = vmul.f32 %v556_v60, %v350_v52 }
 0x2fb   :  { %373 = vst.msk [vmem:[#allocation2 + $0x8] sm:$0xff] %vm157_vm2, %v371_v61 }
 0x2fc   :  { %372 = vst.msk [vmem:[#allocation2] sm:$0xff] %vm157_vm2, %v370_v62 }
 0x302   :  { %v378_v1 = vld [vmem:[#allocation2 + $0x8] sm:$0xff] }
 0x303   :  { %v377_v0 = vld [vmem:[#allocation2] sm:$0xff]  ;;  %v387_v4 = vmul.f32 %v468_v63, %v378_v1 }
 0x304   :  { %v386_v2 = vmul.f32 %v468_v63, %v377_v0 }
 0x305   :  { %v391_v5 = vsel %vm157_vm2, %v387_v4, 0.0 }
 0x306   :  { %v388_v3 = vsel %vm157_vm2, %v386_v2, 0.0 }
 0x307   :  { %389 = vadd.xlane.f32.xlu0 %v388_v3 }
 0x30b   :  { %392 = vadd.xlane.f32.xlu0 %v391_v5 }
 0x394   :  { %v390_v7 = vpop.xlane.xlu0 %389 }
 0x395   :  { %v401_v8 = vadd.f32 %v469_v6, %v390_v7 }
 0x397   :  { %403 = vxpose.xlu1.b32.start [1/2] (short) (narrow) %v401_v8, 8 }
 0x398   :  { %v393_v9 = vpop.xlane.xlu0 %392 }
 0x399   :  { %v402_v10 = vadd.f32 %v469_v6, %v393_v9 }
 0x39b   :  { %404 = vxpose.xlu1.b32.end [2/2] (short) (narrow) %v402_v10, 8 }
 0x417   :  { %v419_v11 = vpop.trf.xlu1 }
 0x418   :  { %436 = vst.msk [vmem:[#allocation7] sm:$0x1] %vm435_vm3, %v419_v11 }
 0x419   :  { %590 = shalt.err (!%p587_p12)
}
 0x41a   :  { %s591_s30 = scalar_lea.hbm %s714_s7, 16 }
 0x41b   :  { %p592_p13 = scmp.ne.s32.totalorder %s714_s7, %s591_s30  ;;  %p595_p0 = scmp.lt.u32.totalorder %s591_s30, %s714_s7 }
 0x41d   :  { %p597_p1 = pnand %p595_p0, %p592_p13 }
 0x41f   :  { %600 = shalt.err (!%p597_p1)
}
 0x420   :  { %446 = dma.vmem_to_hbm [thread:$0]  %s444_s26, 16, %s714_s7, [#allocation6]  }
 0x421   :  { %603 = dma.done.wait [#allocation6], 16  }
 0x422   :  { %604 = vsyncadd [#allocation6], 4294967280 }
 0x423   :  { %450 = vsyncpa [#allocation5], 1 }
 0x424   :  { %451 = vsyncpa [#allocation6], 1 }

</bundles_post_ra>
